<compile_context>
chip_gen: v7x
topology: tpu7x:2x2x1
jax: 0.10.0
libtpu: 0.0.40
codegen_flags: <defaults>
</compile_context>

<pallas_src>
import numpy as np
import jax
import jax.numpy as jnp
from jax import lax
from jax.experimental import pallas as pl
from jax.experimental.pallas import tpu as pltpu


def _round_up(x, m):
    return ((x + m - 1) // m) * m


def _build_constants(D, L, pos_start, pack):
    """Block-diagonal frequency matrix and phase row for the packed layout."""
    out_dim = D * 2 * L
    freq = (2.0 ** np.arange(pos_start, pos_start + L, dtype=np.float64) * np.pi
            ).astype(np.float32)                       # (L,)
    F = np.zeros((D, out_dim), dtype=np.float32)
    phase = np.zeros((out_dim,), dtype=np.float32)
    for d in range(D):
        F[d, d * 2 * L: d * 2 * L + L] = freq          # cos half
        F[d, d * 2 * L + L: (d + 1) * 2 * L] = freq    # sin half
        phase[d * 2 * L + L: (d + 1) * 2 * L] = np.pi / 2.0   # sin(x) = cos(x - pi/2)
    # Pack `pack` logical rows per physical (lane-dense) row -> block diagonal.
    Fp = np.zeros((pack * D, pack * out_dim), dtype=np.float32)
    for p in range(pack):
        Fp[p * D:(p + 1) * D, p * out_dim:(p + 1) * out_dim] = F
    phasep = np.tile(phase, pack).reshape(1, pack * out_dim)
    return jnp.asarray(Fp), jnp.asarray(phasep)


def _pe_kernel(pos_ref, f_ref, phase_ref, out_ref):
    # (TN, P*D) @ (P*D, P*out_dim) -> lane-dense angles on the MXU.
    ang = jnp.dot(pos_ref[...], f_ref[...],
                  preferred_element_type=jnp.float32,
                  precision=lax.Precision.HIGHEST)
    # One full-width EUP cos covers both cos and sin halves via the phase row.
    out_ref[...] = jnp.cos(ang - phase_ref[...])


def positional_encoder(pos, num_features, pos_length=8, pos_start=0,
                       max_rows_per_tile=1024):
    """JAX/Pallas equivalent of Positional_Encoder.forward."""
    orig_shape = pos.shape
    D = orig_shape[-1]
    L = pos_length
    out_dim = D * 2 * L

    pos2d = pos.reshape(-1, D).astype(jnp.float32)
    N = pos2d.shape[0]

    # Pack logical rows so the output block is 128-lane dense (unmasked stores).
    pack = 128 // out_dim if (out_dim <= 128 and 128 % out_dim == 0) else 1
    W = pack * out_dim                      # packed output width (128 by default)

    n_packed_raw = -(-N // pack)            # ceil(N / pack)
    if n_packed_raw >= max_rows_per_tile:
        TN = max_rows_per_tile
    else:
        TN = _round_up(max(n_packed_raw, 1), 8)
    n_packed = _round_up(n_packed_raw, TN)  # pad up to a tile multiple
    n_pad = n_packed * pack

    if n_pad != N:
        pos2d = jnp.pad(pos2d, ((0, n_pad - N), (0, 0)))
    packed_in = pos2d.reshape(n_packed, pack * D)

    F, phase = _build_constants(D, L, pos_start, pack)

    grid = (n_packed // TN,)
    out = pl.pallas_call(
        _pe_kernel,
        out_shape=jax.ShapeDtypeStruct((n_packed, W), jnp.float32),
        grid=grid,
        in_specs=[
            pl.BlockSpec((TN, pack * D), lambda i: (i, 0)),
            pl.BlockSpec((pack * D, W), lambda i: (0, 0)),
            pl.BlockSpec((1, W), lambda i: (0, 0)),
        ],
        out_specs=pl.BlockSpec((TN, W), lambda i: (i, 0)),
        compiler_params=pltpu.CompilerParams(dimension_semantics=("parallel",)),
    )(packed_in, F, phase)

    # Un-pack, drop row padding, restore leading dims, apply feature slice (glue).
    out = out.reshape(n_pad, out_dim)[:N]
    out = out.reshape(*orig_shape[:-1], out_dim)
    return out[..., :num_features]


def positional_encoder_ref(pos, num_features, pos_length=8, pos_start=0):
    """Pure-JAX reference mirroring the torch code exactly."""
    orig_shape = pos.shape
    p = pos.reshape(-1, orig_shape[-1]).astype(jnp.float32)
    index = jnp.arange(pos_start, pos_start + pos_length, dtype=jnp.float32)
    freq = (2.0 ** index) * jnp.pi
    ang = freq.reshape(1, 1, -1) * p[..., None]
    emb = jnp.concatenate([jnp.cos(ang), jnp.sin(ang)], axis=-1)
    emb = emb.reshape(*orig_shape[:-1], -1)
    return emb[..., :num_features]


if __name__ == "__main__":
    # Module hyper-parameters (deterministic, in-script).
    pos_length = 8
    num_features = 48          # must be <= D * 2 * pos_length = 64

    # Example input: batch=2, 16 points, 4 coordinates each -> pos (2, 16, 4)
    key = jax.random.PRNGKey(0)
    pos = jax.random.uniform(key, (2, 16, 4), dtype=jnp.float32,
                             minval=-1.0, maxval=1.0)

    out = positional_encoder(pos, num_features, pos_length=pos_length)
    out = jax.block_until_ready(out)

    ref = positional_encoder_ref(pos, num_features, pos_length=pos_length)
    assert out.shape == (2, 16, num_features), out.shape
    # Tolerance covers the sin(x)=cos(x-pi/2) trick + MXU f32-emulation ulps at
    # angles up to 2^7*pi.
    assert jnp.allclose(out, ref, atol=1e-3, rtol=1e-3), "mismatch vs reference"

    print("KERNEL_OK")
</pallas_src>

<mosaic_0001>
module attributes {stable_mosaic.version = 11 : i64} {
  func.func @_pe_kernel(%arg0: i32, %arg1: memref<16x8xf32, #tpu.memory_space<vmem>>, %arg2: memref<8x128xf32, #tpu.memory_space<vmem>>, %arg3: memref<1x128xf32, #tpu.memory_space<vmem>>, %arg4: memref<16x128xf32, #tpu.memory_space<vmem>>) attributes {dimension_semantics = [#tpu.dimension_semantics<parallel>], iteration_bounds = array<i64: 1>, scalar_prefetch = 0 : i64, scratch_operands = 0 : i64, tpu.core_type = #tpu.core_type<tc>, window_params = [{transform_indices = @transform_0, window_bounds = array<i64: 16, 8>}, {pipeline_mode = #tpu.pipeline_mode<synchronous>, transform_indices = @transform_1, window_bounds = array<i64: 8, 128>}, {pipeline_mode = #tpu.pipeline_mode<synchronous>, transform_indices = @transform_2, window_bounds = array<i64: 1, 128>}, {transform_indices = @transform_3, window_bounds = array<i64: 16, 128>}]} {
    %c0 = arith.constant 0 : index
    %c0_0 = arith.constant 0 : index
    %0 = vector.load %arg1[%c0, %c0_0] : memref<16x8xf32, #tpu.memory_space<vmem>>, vector<16x8xf32>
    %c0_1 = arith.constant 0 : index
    %c0_2 = arith.constant 0 : index
    %1 = vector.load %arg2[%c0_1, %c0_2] : memref<8x128xf32, #tpu.memory_space<vmem>>, vector<8x128xf32>
    %cst = arith.constant dense<0.000000e+00> : vector<16x128xf32>
    %2 = tpu.matmul %0, %1, %cst {dimension_numbers = #tpu.dot_dimension_numbers<[1], [0], [0], [1], [0, 0, 1, 1], [], []>, precision = #tpu.contract_precision<fp32>} : vector<16x8xf32>, vector<8x128xf32>, vector<16x128xf32> -> vector<16x128xf32>
    %c0_3 = arith.constant 0 : index
    %c0_4 = arith.constant 0 : index
    %3 = vector.load %arg3[%c0_3, %c0_4] : memref<1x128xf32, #tpu.memory_space<vmem>>, vector<1x128xf32>
    %4 = vector.broadcast %3 : vector<1x128xf32> to vector<16x128xf32>
    %5 = arith.subf %2, %4 : vector<16x128xf32>
    %6 = math.cos %5 : vector<16x128xf32>
    %c0_5 = arith.constant 0 : index
    %c0_6 = arith.constant 0 : index
    %7 = vector.load %arg4[%c0_5, %c0_6] : memref<16x128xf32, #tpu.memory_space<vmem>>, vector<16x128xf32>
    tpu.vector_store %arg4[%c0_5, %c0_6], %6 {strides = array<i32>} : memref<16x128xf32, #tpu.memory_space<vmem>>, vector<16x128xf32>,
    return
  }
  func.func @transform_0(%arg0: i32) -> (i32, i32) {
    %c0_i32 = arith.constant 0 : i32
    %c0_i32_0 = arith.constant 0 : i32
    return %arg0, %c0_i32 : i32, i32
  }
  func.func @transform_1(%arg0: i32) -> (i32, i32) {
    %c0_i32 = arith.constant 0 : i32
    %c0_i32_0 = arith.constant 0 : i32
    %c0_i32_1 = arith.constant 0 : i32
    return %c0_i32, %c0_i32_0 : i32, i32
  }
  func.func @transform_2(%arg0: i32) -> (i32, i32) {
    %c0_i32 = arith.constant 0 : i32
    %c0_i32_0 = arith.constant 0 : i32
    %c0_i32_1 = arith.constant 0 : i32
    return %c0_i32, %c0_i32_0 : i32, i32
  }
  func.func @transform_3(%arg0: i32) -> (i32, i32) {
    %c0_i32 = arith.constant 0 : i32
    %c0_i32_0 = arith.constant 0 : i32
    return %arg0, %c0_i32 : i32, i32
  }
}

</mosaic_0001>

<bundles_post_ra>
// kernel: tpu_custom_call.1
= control target key start
LH: loop header
LB: loop body
LE: loop exit
PB: predicated region body
PF: predicated region fallthrough
CT: control target
= control target key end

     0   :  { %vm18_vm0 = vcmask 64512   ;;  %s994_s0 = inlined_call_operand.vmem [shape: f32[16,8], index: 0, kind: input, shape index: {}]   ;;  %s995_s1 = inlined_call_operand.vmem [shape: f32[8,128], index: 1, kind: input, shape index: {}]   ;;  %s996_s2 = inlined_call_operand.vmem [shape: f32[1,128], index: 2, kind: input, shape index: {}]   ;;  %s997_s3 = inlined_call_operand.hbm [shape: f32[16,128], index: 3, kind: output, shape index: {}]  }
   0x1   :  { %v17_v0 = vld [vmem:[%s995_s1] sm:$0xff]  ;;  %v16_v2 = vld [vmem:[%s994_s0 + $0x8] sm:$0xff] }
   0x2   :  { %v15_v1 = vld [vmem:[%s994_s0] sm:$0xff]  ;;  %v26_v3 = vand.u32 4294901760, %v17_v0  ;;  %v23_v5 = vsel %vm18_vm0, %v16_v2, 0 }
   0x3   :  { %v20_v4 = vsel %vm18_vm0, %v15_v1, 0 }
   0x4   :  { %8 = vsyncpa [#allocation3], 0  ;;  %v91_v6 = vand.u32 4294901760, %v20_v4  ;;  %v101_v7 = vand.u32 4294901760, %v23_v5  ;;  %789 = vmatprep.subr.mxu0 %v26_v3  ;;  %774 = vmatprep.subr.mxu1 %v26_v3  ;;  %v113_v8 = vsub.f32 %v17_v0, %v26_v3  ;;  %v747_v23 = vld [vmem:[%s996_s2] ss:$0 sm:$0xff] }
   0x5   :  { %790 = vmatpush3.msra.mxu0 %v26_v3  ;;  %775 = vmatpush3.msra.mxu1 %v26_v3  ;;  %v863_v49 = vmov 683565275   ;;  %v864_v53 = vmov 2475754826   ;;  %v865_v55 = vmov 2131351028  }
   0x6   :  { %v92_v9 = vsub.f32 %v20_v4, %v91_v6  ;;  %v102_v10 = vsub.f32 %v23_v5, %v101_v7  ;;  %v114_v11 = vand.u32 4294901760, %v113_v8  ;;  %v866_v57 = vmov 2102212464   ;;  %s869_s2 = smov [#allocation2]  }
   0x7   :  { %v867_v59 = vmov 920167782   ;;  %v868_v2 = vmov 1326507024   ;;  %s736_s18 = sshll.u32 %s869_s2, 4  ;;  %s737_s18 = int_to_ptr.vmem [resolvable:$true] %s736_s18 }
   0x8   :  { %v93_v12 = vand.u32 4294901760, %v92_v9  ;;  %v103_v13 = vand.u32 4294901760, %v102_v10  ;;  %v115_v14 = vsub.f32 %v113_v8, %v114_v11  ;;  %794 = vmatprep.subr.mxu0 %v114_v11  ;;  %s839_s19 = scalar_lea.vmem %s737_s18, 256  ;;  %p844_p1 = scmp.lt.s32.totalorder %s737_s18, %s737_s18 }
   0x9   :  { %p840_p0 = scmp.ne.s32.totalorder %s737_s18, %s839_s19  ;;  %p845_p2 = scmp.lt.s32.totalorder %s839_s19, %s839_s19 }
   0xa   :  { %791 = vmatprep.mubr.f32.mxu0 %v93_v12  ;;  %v94_v15 = vsub.f32 %v92_v9, %v93_v12  ;;  %v104_v16 = vsub.f32 %v102_v10, %v103_v13  ;;  %v116_v17 = vand.u32 4294901760, %v115_v14 }
   0xb   :  { %792 = vmatmul.mubr.f32.vlgmr.msra.gmra.mrb[0].mxu0 %v103_v13  ;;  %p846_p3 = por %p845_p2, %p844_p1 }
   0xc   :  { %v95_v18 = vand.u32 4294901760, %v94_v15  ;;  %v105_v19 = vand.u32 4294901760, %v104_v16  ;;  %795 = vmatpush3.msra.mxu0 %v114_v11  ;;  %796 = vmatprep.mubr.f32.mxu0 %v91_v6 }
   0xd   :  { %779 = vmatprep.subr.mxu1 %v116_v17  ;;  %799 = vmatprep.subr.mxu0 %v26_v3  ;;  %p847_p4 = pnand %p846_p3, %p840_p0 }
   0xe   :  { %776 = vmatprep.mubr.f32.mxu1 %v95_v18 }
   0xf   :  { %777 = vmatmul.mubr.f32.vlgmr.msra.gmra.mrb[0].mxu1 %v105_v19 }
  0x10   :  { %780 = vmatpush3.msra.mxu1 %v116_v17  ;;  %781 = vmatprep.mubr.f32.mxu1 %v91_v6 }
  0x11   :  { %784 = vmatprep.subr.mxu1 %v113_v8 }
  0x13   :  { %797 = vmatmul.mubr.f32.vlgmr.msra.gmra.mrb[0].mxu0 %v101_v7 }
  0x14   :  { %800 = vmatpush3.msra.mxu0 %v26_v3  ;;  %801 = vmatprep.mubr.f32.mxu0 %v91_v6 }
  0x17   :  { %782 = vmatmul.mubr.f32.vlgmr.msra.gmra.mrb[0].mxu1 %v101_v7 }
  0x18   :  { %785 = vmatpush3.msra.mxu1 %v113_v8  ;;  %786 = vmatprep.mubr.f32.mxu1 %v92_v9 }
  0x1b   :  { %802 = vmatmul.mubr.f32.vlgmr.msra.gmra.mrb[0].mxu0 %v101_v7 }
  0x1f   :  { %787 = vmatmul.mubr.f32.vlgmr.msra.gmra.mrb[0].mxu1 %v102_v10 }
  0xee   :  { %v803_v20 = vpop.f32.mrb[0].mxu0 }
  0xef   :  { %v504_v21 = vpop.f32.mrb[1].mxu0 }
  0xf2   :  { %v788_v22 = vpop.f32.mrb[0].mxu1 }
  0xf3   :  { %v804_v24 = vadd.f32 %v803_v20, %v788_v22  ;;  %v263_v25 = vpop.f32.mrb[1].mxu1 }
  0xf4   :  { %v805_v26 = vadd.f32 %v504_v21, %v263_v25 }
  0xf5   :  { %v904_v27 = vsub.f32 %v804_v24, %v747_v23 }
  0xf6   :  { %v906_v28 = vsub.f32 %v805_v26, %v747_v23 }
  0xf7   :  { %v626_v29 = vand.u32 2147483647, %v904_v27  ;;  %v629_v30 = vand.u32 2139095040, %v904_v27  ;;  %vm628_vm15 = vcmp.lt.s32.totalorder %v904_v27, 0 }
  0xf8   :  { %v526_v31 = vand.u32 2139095040, %v906_v28  ;;  %v523_v34 = vand.u32 2147483647, %v906_v28 }
  0xf9   :  { %v630_v32 = vshrl.u32 %v629_v30, 23  ;;  %v633_v33 = vand.u32 8388607, %v626_v29  ;;  %vm959_vm0 = vcmp.le.f32.partialorder %v626_v29, 0.7853982 }
  0xfa   :  { %v527_v35 = vshrl.u32 %v526_v31, 23  ;;  %v916_v40 = vand.u32 8388607, %v523_v34 }
  0xfb   :  { %v752_v36 = vadd.s32 4294967169, %v630_v32  ;;  %v634_v39 = vor.u32 8388608, %v633_v33 }
  0xfc   :  { %v748_v37 = vadd.s32 4294967169, %v527_v35  ;;  %v531_v47 = vor.u32 8388608, %v916_v40 }
  0xfd   :  { %v636_v38 = vadd.s32 1, %v752_v36  ;;  %v918_v46 = vshll.u32 %v634_v39, 8 }
  0xfe   :  { %v533_v41 = vadd.s32 1, %v748_v37 }
  0xff   :  { %vm637_vm1 = vcmp.gt.s32.totalorder %v636_v38, 0 }
 0x100   :  { %v638_v42 = vsel %vm637_vm1, %v636_v38, 0  ;;  %vm534_vm2 = vcmp.gt.s32.totalorder %v533_v41, 0  ;;  %vm525_vm1 = vcmp.lt.s32.totalorder %v906_v28, 0 }
 0x101   :  { %v639_v43 = vshrl.u32 %v638_v42, 5  ;;  %v640_v44 = vand.u32 31, %v638_v42  ;;  %v535_v45 = vsel %vm534_vm2, %v533_v41, 0  ;;  %v571_v41 = vshll.u32 %v531_v47, 8 }
 0x102   :  { %v921_v51 = vshrl.u32 %v535_v45, 5  ;;  %v537_v52 = vand.u32 31, %v535_v45  ;;  %vm971_vm2 = vcmp.le.f32.partialorder %v523_v34, 0.7853982 }
 0x103   :  { %v641_v48 = vsub.s32 32, %v640_v44  ;;  %v643_v50 = vshll.u32 %v863_v49, %v640_v44  ;;  %v646_v54 = vshll.u32 %v864_v53, %v640_v44  ;;  %v649_v56 = vshll.u32 %v865_v55, %v640_v44 }
 0x104   :  { %v652_v58 = vshll.u32 %v866_v57, %v640_v44  ;;  %v655_v60 = vshll.u32 %v867_v59, %v640_v44  ;;  %vm658_vm3 = vcmp.lt.s32.totalorder %v639_v43, 1  ;;  %vm659_vm4 = vcmp.lt.s32.totalorder %v639_v43, 2 }
 0x105   :  { %v644_v61 = vshrl.u32 %v864_v53, %v641_v48  ;;  %v647_v62 = vshrl.u32 %v865_v55, %v641_v48  ;;  %v650_v63 = vshrl.u32 %v866_v57, %v641_v48  ;;  %v642_v0 = vshrl.u32 %v863_v49, %v641_v48 }
 0x106   :  { %v653_v1 = vshrl.u32 %v867_v59, %v641_v48  ;;  %v656_v3 = vshrl.u32 %v868_v2, %v641_v48  ;;  %v538_v7 = vsub.s32 32, %v537_v52  ;;  %vm660_vm5 = vcmp.lt.s32.totalorder %v639_v43, 3 }
 0x107   :  { %v645_v4 = vor.u32 %v644_v61, %v643_v50  ;;  %v648_v5 = vor.u32 %v647_v62, %v646_v54  ;;  %v651_v6 = vor.u32 %v650_v63, %v649_v56  ;;  %vm661_vm6 = vcmp.lt.s32.totalorder %v639_v43, 4 }
 0x108   :  { %v654_v8 = vor.u32 %v653_v1, %v652_v58  ;;  %v657_v9 = vor.u32 %v656_v3, %v655_v60  ;;  %v540_v17 = vshll.u32 %v863_v49, %v537_v52  ;;  %v541_v20 = vshrl.u32 %v864_v53, %v538_v7 }
 0x109   :  { %v662_v10 = vsel %vm658_vm3, %v642_v0, %v645_v4  ;;  %v663_v11 = vsel %vm661_vm6, %v651_v6, 2102212464  ;;  %v666_v12 = vsel %vm658_vm3, %v645_v4, %v648_v5  ;;  %v670_v13 = vsel %vm658_vm3, %v648_v5, %v651_v6 }
 0x10a   :  { %v664_v14 = vsel %vm660_vm5, %v648_v5, %v663_v11  ;;  %v667_v15 = vsel %vm661_vm6, %v654_v8, 920167782  ;;  %v671_v16 = vsel %vm661_vm6, %v657_v9, 1326507024  ;;  %v543_v21 = vshll.u32 %v864_v53, %v537_v52 }
 0x10b   :  { %v668_v18 = vsel %vm660_vm5, %v651_v6, %v667_v15  ;;  %v672_v19 = vsel %vm660_vm5, %v654_v8, %v671_v16  ;;  %v665_v22 = vsel %vm659_vm4, %v662_v10, %v664_v14  ;;  %v544_v25 = vshrl.u32 %v865_v55, %v538_v7 }
 0x10c   :  { %v669_v23 = vsel %vm659_vm4, %v666_v12, %v668_v18  ;;  %v673_v24 = vsel %vm659_vm4, %v670_v13, %v672_v19  ;;  %v542_v33 = vor.u32 %v541_v20, %v540_v17  ;;  %v546_v36 = vshll.u32 %v865_v55, %v537_v52 }
 0x10d   :  { %v930_v26 = vmul.u32.u64.low %v918_v46, %v673_v24  ;;  %v931_v30 = vmul.u32.u64.high %v918_v46, %v673_v24, %v930_v26  ;;  %v934_v31 = vmul.u32.u64.low %v918_v46, %v669_v23  ;;  %v935_v32 = vmul.u32.u64.high %v918_v46, %v669_v23, %v934_v31 }
 0x10e   :  { %v545_v35 = vor.u32 %v544_v25, %v543_v21  ;;  %v547_v37 = vshrl.u32 %v866_v57, %v538_v7  ;;  %v549_v38 = vshll.u32 %v866_v57, %v537_v52  ;;  %v550_v39 = vshrl.u32 %v867_v59, %v538_v7 }
 0x10f   :  { %v553_v40 = vshrl.u32 %v868_v2, %v538_v7  ;;  %v681_v42 = vmul.u32 %v918_v46, %v665_v22  ;;  %v539_v43 = vshrl.u32 %v863_v49, %v538_v7  ;;  %v552_v45 = vshll.u32 %v867_v59, %v537_v52 }
 0x110   :  { %v548_v44 = vor.u32 %v547_v37, %v546_v36  ;;  %vm683_vm7 = vc.u32 %v931_v30, %v934_v31  ;;  %v684_v48 = vadd.s32 1, %v935_v32  ;;  %v551_v50 = vor.u32 %v550_v39, %v549_v38 }
 0x111   :  { %vm555_vm8 = vcmp.lt.s32.totalorder %v921_v51, 1  ;;  %v554_v53 = vor.u32 %v553_v40, %v552_v45  ;;  %vm557_vm9 = vcmp.lt.s32.totalorder %v921_v51, 3  ;;  %vm558_vm10 = vcmp.lt.s32.totalorder %v921_v51, 4 }
 0x112   :  { %v563_v54 = vsel %vm555_vm8, %v542_v33, %v545_v35  ;;  %v685_v47 = vsel %vm683_vm7, %v684_v48, %v935_v32  ;;  %v560_v55 = vsel %vm558_vm10, %v548_v44, 2102212464  ;;  %v564_v46 = vsel %vm558_vm10, %v551_v50, 920167782 }
 0x113   :  { %v567_v49 = vsel %vm555_vm8, %v545_v35, %v548_v44  ;;  %v686_v56 = vadd.s32 %v685_v47, %v681_v42  ;;  %vm556_vm11 = vcmp.lt.s32.totalorder %v921_v51, 2  ;;  %v565_v52 = vsel %vm557_vm9, %v548_v44, %v564_v46 }
 0x114   :  { %v568_v57 = vsel %vm558_vm10, %v554_v53, 1326507024  ;;  %v559_v58 = vsel %vm555_vm8, %v539_v43, %v542_v33  ;;  %v561_v59 = vsel %vm557_vm9, %v545_v35, %v560_v55  ;;  %v566_v60 = vsel %vm556_vm11, %v563_v54, %v565_v52 }
 0x115   :  { %v569_v61 = vsel %vm557_vm9, %v551_v50, %v568_v57  ;;  %v687_v62 = vadd.s32 536870912, %v686_v56  ;;  %v945_v0 = vmul.u32.u64.low %v571_v41, %v566_v60  ;;  %v946_v1 = vmul.u32.u64.high %v571_v41, %v566_v60, %v945_v0 }
 0x116   :  { %v570_v63 = vsel %vm556_vm11, %v567_v49, %v569_v61  ;;  %v562_v5 = vsel %vm556_vm11, %v559_v58, %v561_v59  ;;  %v682_v21 = vadd.s32 %v934_v31, %v931_v30  ;;  %vm718_vm6 = vweird.f32 %v904_v27 }
 0x117   :  { %v948_v2 = vmul.u32.u64.low %v571_v41, %v570_v63  ;;  %v949_v3 = vmul.u32.u64.high %v571_v41, %v570_v63, %v948_v2  ;;  %v688_v4 = vshrl.u32 %v687_v62, 30  ;;  %v581_v7 = vadd.s32 1, %v946_v1 }
 0x118   :  { %v578_v51 = vmul.u32 %v571_v41, %v562_v5  ;;  %vm615_vm10 = vweird.f32 %v906_v28 }
 0x119   :  { %v689_v6 = vshll.u32 %v688_v4, 30  ;;  %vm580_vm12 = vc.u32 %v949_v3, %v945_v0  ;;  %v579_v42 = vadd.s32 %v945_v0, %v949_v3  ;;  %v712_v46 = vsub.s32 4, %v688_v4 }
 0x11a   :  { %v582_v9 = vsel %vm580_vm12, %v581_v7, %v946_v1 }
 0x11b   :  { %v690_v8 = vsub.s32 %v686_v56, %v689_v6  ;;  %v583_v10 = vadd.s32 %v582_v9, %v578_v51  ;;  %v713_v58 = vsel %vm628_vm15, %v712_v46, %v688_v4 }
 0x11c   :  { %v715_v29 = vsel %vm959_vm0, 0, %v713_v58 }
 0x11d   :  { %v692_v11 = vsub.s32 0, %v690_v8  ;;  %v584_v12 = vadd.s32 536870912, %v583_v10  ;;  %v719_v1 = vand.u32 3, %v715_v29 }
 0x11f   :  { %v753_v13 = vmin.u32 %v692_v11, %v690_v8  ;;  %v585_v14 = vshrl.u32 %v584_v12, 30  ;;  %vm724_vm3 = vcmp.eq.s32.totalorder %v719_v1, 2  ;;  %vm721_vm4 = vcmp.eq.s32.totalorder %v719_v1, 0 }
 0x120   :  { %vm720_vm5 = vcmp.lt.s32.totalorder %v719_v1, 2 }
 0x121   :  { %v694_v15 = vclz %v753_v13  ;;  %v586_v16 = vshll.u32 %v585_v14, 30  ;;  %v609_v63 = vsub.s32 4, %v585_v14 }
 0x123   :  { %v754_v17 = vadd.s32 4294967294, %v694_v15  ;;  %v587_v18 = vsub.s32 %v583_v10, %v586_v16  ;;  %v610_v4 = vsel %vm525_vm1, %v609_v63, %v585_v14 }
 0x124   :  { %v612_v7 = vsel %vm971_vm2, 0, %v610_v4 }
 0x125   :  { %vm755_vm13 = vcmp.lt.s32.totalorder %v754_v17, 0  ;;  %v589_v20 = vsub.s32 0, %v587_v18  ;;  %v616_v10 = vand.u32 3, %v612_v7 }
 0x126   :  { %v697_v19 = vsel %vm755_vm13, 0, %v754_v17 }
 0x127   :  { %v698_v22 = vsub.s32 32, %v697_v19  ;;  %v702_v23 = vsub.s32 4294967266, %v697_v19  ;;  %v749_v24 = vmin.u32 %v589_v20, %v587_v18  ;;  %v699_v25 = vshll.u32 %v690_v8, %v697_v19 }
 0x128   :  { %vm621_vm7 = vcmp.eq.s32.totalorder %v616_v10, 2  ;;  %vm618_vm8 = vcmp.eq.s32.totalorder %v616_v10, 0  ;;  %vm617_vm9 = vcmp.lt.s32.totalorder %v616_v10, 2 }
 0x129   :  { %v700_v26 = vshrl.u32 %v682_v21, %v698_v22  ;;  %v703_v32 = vadd.s32 127, %v702_v23  ;;  %v591_v33 = vclz %v749_v24 }
 0x12b   :  { %v701_v35 = vor.u32 %v700_v26, %v699_v25  ;;  %v704_v36 = vshll.u32 %v703_v32, 23  ;;  %v750_v37 = vadd.s32 4294967294, %v591_v33 }
 0x12d   :  { %v705_v38 = vor.u32 4788187, %v704_v36  ;;  %vm751_vm14 = vcmp.lt.s32.totalorder %v750_v37, 0  ;;  %v708_v40 = vcvt.s32.f32 %v701_v35 }
 0x12e   :  { %v594_v41 = vsel %vm751_vm14, 0, %v750_v37 }
 0x12f   :  { %v706_v39 = vand.u32 2147483647, %v705_v38  ;;  %v595_v43 = vsub.s32 32, %v594_v41  ;;  %v599_v44 = vsub.s32 4294967266, %v594_v41  ;;  %v596_v31 = vshll.u32 %v587_v18, %v594_v41 }
 0x131   :  { %v709_v30 = vmul.f32 %v708_v40, %v706_v39  ;;  %v597_v45 = vshrl.u32 %v579_v42, %v595_v43  ;;  %v600_v48 = vadd.s32 127, %v599_v44 }
 0x133   :  { %v710_v50 = vxor.u32 2147483648, %v709_v30  ;;  %v598_v53 = vor.u32 %v597_v45, %v596_v31  ;;  %v601_v54 = vshll.u32 %v600_v48, 23 }
 0x135   :  { %v711_v55 = vsel %vm628_vm15, %v710_v50, %v709_v30  ;;  %v602_v56 = vor.u32 4788187, %v601_v54  ;;  %v605_v57 = vcvt.s32.f32 %v598_v53 }
 0x136   :  { %v714_v49 = vsel %vm959_vm0, %v904_v27, %v711_v55 }
 0x137   :  { %831 = vcosq.f32 %v714_v49  ;;  %v603_v52 = vand.u32 2147483647, %v602_v56 }
 0x138   :  { %833 = vsinq.f32 %v714_v49 }
 0x139   :  { %v606_v59 = vmul.f32 %v605_v57, %v603_v52 }
 0x13b   :  { %v607_v60 = vxor.u32 2147483648, %v606_v59 }
 0x13d   :  { %v608_v62 = vsel %vm525_vm1, %v607_v60, %v606_v59 }
 0x13e   :  { %v611_v0 = vsel %vm971_vm2, %v906_v28, %v608_v62 }
 0x13f   :  { %835 = vcosq.f32 %v611_v0 }
 0x140   :  { %837 = vsinq.f32 %v611_v0 }
 0x141   :  { %v832_v2 = vpop.eup %831 }
 0x142   :  { %v834_v3 = vpop.eup %833  ;;  %v725_v5 = vxor.u32 2147483648, %v832_v2 }
 0x143   :  { %v722_v6 = vxor.u32 2147483648, %v834_v3 }
 0x144   :  { %v726_v34 = vsel %vm724_vm3, %v725_v5, %v834_v3 }
 0x145   :  { %v723_v51 = vsel %vm721_vm4, %v832_v2, %v722_v6 }
 0x146   :  { %v727_v8 = vsel %vm720_vm5, %v723_v51, %v726_v34 }
 0x147   :  { %v728_v9 = vsel %vm718_vm6, nan, %v727_v8 }
 0x148   :  { %730 = vst [vmem:[#allocation2 + $0x8] sm:$0xff] %v728_v9 }
 0x149   :  { %v836_v11 = vpop.eup %835 }
 0x14a   :  { %v838_v12 = vpop.eup %837  ;;  %v622_v13 = vxor.u32 2147483648, %v836_v11 }
 0x14b   :  { %v619_v14 = vxor.u32 2147483648, %v838_v12 }
 0x14c   :  { %v623_v15 = vsel %vm621_vm7, %v622_v13, %v838_v12 }
 0x14d   :  { %v620_v16 = vsel %vm618_vm8, %v836_v11, %v619_v14 }
 0x14e   :  { %v624_v17 = vsel %vm617_vm9, %v620_v16, %v623_v15 }
 0x14f   :  { %v625_v27 = vsel %vm615_vm10, nan, %v624_v17 }
 0x150   :  { %729 = vst [vmem:[#allocation2] sm:$0xff] %v625_v27 }
 0x151   :  { %850 = shalt.err (!%p847_p4)
}
 0x152   :  { %s851_s22 = scalar_lea.hbm %s997_s3, 256 }
 0x153   :  { %p852_p5 = scmp.ne.s32.totalorder %s997_s3, %s851_s22  ;;  %p855_p6 = scmp.lt.u32.totalorder %s851_s22, %s997_s3 }
 0x155   :  { %p857_p7 = pnand %p855_p6, %p852_p5 }
 0x157   :  { %860 = shalt.err (!%p857_p7)
}
 0x158   :  { %s870_s27 = smov 128   ;;  %s871_s28 = smov 8  }
 0x159   :  { %742 = dma.vmem_to_hbm [thread:$0]  %s737_s18, 256, %s997_s3, [#allocation3], %s870_s27, %s870_s27, %s871_s28  }
 0x15a   :  { %861 = dma.done.wait [#allocation3], 256  }
 0x15b   :  { %862 = vsyncadd [#allocation3], 4294967040 }
 0x15c   :  { %746 = vsyncpa [#allocation3], 1 }

</bundles_post_ra>
